<compile_context>
chip_gen: v6e
topology: v6e:2x2x1
jax: 0.10.0
libtpu: 0.0.40
codegen_flags: <defaults>
</compile_context>

<pallas_src>
import math

import jax
import jax.numpy as jnp
from jax import lax
from jax.experimental import pallas as pl
from jax.experimental.pallas import tpu as pltpu

EPS = 1e-5       # BatchNorm1d default eps
LANE = 128
INV_SQRT2 = 1.0 / math.sqrt(2.0)


def _round_up(x, m):
    return (x + m - 1) // m * m


def _divisors_desc(n):
    return sorted((d for d in range(1, n + 1) if n % d == 0), reverse=True)


def _choose_batch_block(n, l, cin_p, cout_p, k,
                        vmem_budget=12 * 1024 * 1024, row_cap=1024):
    """Largest divisor nb of n whose pass-1 working set fits the VMEM budget."""
    for nb in _divisors_desc(n):
        rows = nb * l
        est = (2 * nb * (l + k - 1) * cin_p * 2      # input tile, 2 bufs, bf16
               + 2 * k * cin_p * cout_p * 2          # weights, 2 bufs, bf16
               + 2 * nb * l * cout_p * 4             # conv out tile, 2 bufs, f32
               + rows * k * cin_p * 2                # im2col staging, bf16
               + rows * cout_p * 4)                  # f32 matmul result
        if rows <= row_cap and est <= vmem_budget:
            return nb
    return 1


def _make_conv_stats_kernel(k):
    def conv_stats_kernel(x_ref, w_ref, conv_ref, stats_ref):
        # x_ref:     (nb, L + K - 1, Cin_p)  bf16, 'same'-padded input tile
        # w_ref:     (K * Cin_p, Cout_p)     bf16, tap-major im2col weight
        # conv_ref:  (nb, L, Cout_p)         f32 conv output tile
        # stats_ref: (1, 2, Cout_p)          f32 per-block (sum, sum_sq)
        nb, lp, cin_p = x_ref.shape
        l_out = lp - (k - 1)
        cout_p = w_ref.shape[1]

        # im2col: K shifted views concatenated along channels -> one wide MXU
        # contraction over K*Cin_p instead of K skinny matmuls.
        cols = [x_ref[:, t:t + l_out, :] for t in range(k)]
        xc = jnp.concatenate(cols, axis=-1).reshape(nb * l_out, k * cin_p)
        acc = jnp.dot(xc, w_ref[...], preferred_element_type=jnp.float32)

        conv_ref[...] = acc.reshape(nb, l_out, cout_p)

        # Streamed BatchNorm statistics: per-channel sum and sum of squares.
        s = jnp.sum(acc, axis=0, keepdims=True)            # (1, Cout_p)
        ss = jnp.sum(acc * acc, axis=0, keepdims=True)     # (1, Cout_p)
        stats_ref[...] = jnp.concatenate([s, ss], axis=0)[None]
    return conv_stats_kernel


def bn_gelu_kernel(y_ref, scale_ref, shift_ref, o_ref):
    # y = conv * (gamma*inv_std) + (beta - mean*gamma*inv_std); exact erf GELU.
    z = y_ref[...] * scale_ref[...] + shift_ref[...]
    o_ref[...] = (0.5 * z * (1.0 + lax.erf(z * INV_SQRT2))).astype(o_ref.dtype)


def _cnn_layer_impl(x_ncl, weight, gamma, beta, compute_dtype=jnp.bfloat16):
    """x_ncl: (N, C_in, L); weight: (C_out, C_in, K). Returns (N, C_out, L)."""
    n, c_in, l = x_ncl.shape
    c_out, _, k = weight.shape
    cin_p = _round_up(c_in, LANE)
    cout_p = _round_up(c_out, LANE)
    pad_l = (k - 1) // 2
    pad_r = k - 1 - pad_l

    # Layout glue (fuses into one XLA pass): NCL -> NLC, 'same' zero pad on L,
    # zero pad channels to lane width, cast to bf16 (f32 accumulation in-kernel).
    x_nlc = jnp.transpose(x_ncl, (0, 2, 1))
    x_pad = jnp.pad(x_nlc, ((0, 0), (pad_l, pad_r), (0, cin_p - c_in)))
    x_pad = x_pad.astype(compute_dtype)

    w = jnp.transpose(weight, (2, 1, 0))                       # (K, Cin, Cout)
    w = jnp.pad(w, ((0, 0), (0, cin_p - c_in), (0, cout_p - c_out)))
    w = w.reshape(k * cin_p, cout_p).astype(compute_dtype)

    nb = _choose_batch_block(n, l, cin_p, cout_p, k)
    # TODO(synk): for very long L, also halo-tile the length axis in pass 1.
    itemsize = jnp.dtype(compute_dtype).itemsize

    conv, stats = pl.pallas_call(
        _make_conv_stats_kernel(k),
        out_shape=(
            jax.ShapeDtypeStruct((n, l, cout_p), jnp.float32),
            jax.ShapeDtypeStruct((n // nb, 2, cout_p), jnp.float32),
        ),
        grid_spec=pltpu.PrefetchScalarGridSpec(
            num_scalar_prefetch=0,
            grid=(n // nb,),
            in_specs=[
                pl.BlockSpec((nb, l + k - 1, cin_p), lambda i: (i, 0, 0)),
                pl.BlockSpec((k * cin_p, cout_p), lambda i: (0, 0)),
            ],
            out_specs=(
                pl.BlockSpec((nb, l, cout_p), lambda i: (i, 0, 0)),
                pl.BlockSpec((1, 2, cout_p), lambda i: (i, 0, 0)),
            ),
        ),
        compiler_params=pltpu.CompilerParams(
            dimension_semantics=("parallel",)),
        cost_estimate=pl.CostEstimate(
            flops=2 * n * l * k * cin_p * cout_p,
            transcendentals=0,
            bytes_accessed=(n * (l + k - 1) * cin_p * itemsize
                            + k * cin_p * cout_p * itemsize
                            + n * l * cout_p * 4),
        ),
    )(x_pad, w)

    # Finalize BN statistics (tiny per-channel vectors; train-mode batch stats,
    # biased variance, matching a fresh nn.BatchNorm1d in train()).
    cnt = float(n * l)
    tot = jnp.sum(stats, axis=0)                            # (2, Cout_p)
    mean = tot[0] / cnt
    var = jnp.maximum(tot[1] / cnt - mean * mean, 0.0)
    inv = lax.rsqrt(var + EPS)
    gamma_p = jnp.pad(gamma.astype(jnp.float32), (0, cout_p - c_out))
    beta_p = jnp.pad(beta.astype(jnp.float32), (0, cout_p - c_out))
    scale = (gamma_p * inv).reshape(1, cout_p)
    shift = (beta_p - mean * gamma_p * inv).reshape(1, cout_p)
    # TODO(synk): running_mean/running_var side-effect updates are not emitted.

    # Pass 2: flatten to a lane-dense (N*L, Cout_p) slab, big row tiles.
    r = n * l
    r_tile = r if r <= 2048 else 2048          # full dim or a multiple of 8
    conv_flat = conv.reshape(r, cout_p)

    out_flat = pl.pallas_call(
        bn_gelu_kernel,
        out_shape=jax.ShapeDtypeStruct((r, cout_p), jnp.float32),
        grid_spec=pltpu.PrefetchScalarGridSpec(
            num_scalar_prefetch=0,
            grid=(pl.cdiv(r, r_tile),),
            in_specs=[
                pl.BlockSpec((r_tile, cout_p), lambda i: (i, 0)),
                pl.BlockSpec((1, cout_p), lambda i: (0, 0)),
                pl.BlockSpec((1, cout_p), lambda i: (0, 0)),
            ],
            out_specs=pl.BlockSpec((r_tile, cout_p), lambda i: (i, 0)),
        ),
        compiler_params=pltpu.CompilerParams(
            dimension_semantics=("parallel",)),
        input_output_aliases={0: 0},   # normalize+GELU in place over conv buf
        cost_estimate=pl.CostEstimate(
            flops=4 * r * cout_p,
            transcendentals=r * cout_p,
            bytes_accessed=2 * r * cout_p * 4,
        ),
    )(conv_flat, scale, shift)

    out = out_flat.reshape(n, l, cout_p)[:, :, :c_out]      # drop channel pad
    return jnp.transpose(out, (0, 2, 1)).astype(x_ncl.dtype)


cnn_layer = jax.jit(_cnn_layer_impl, static_argnames=("compute_dtype",))


if __name__ == "__main__":
    key = jax.random.PRNGKey(0)
    kx, kw = jax.random.split(key)

    N, C_IN, C_OUT, L, K = 2, 4, 8, 16, 5

    x = jax.random.normal(kx, (N, C_IN, L), jnp.float32)

    # Deterministic parameter init (Conv1d kaiming-uniform-like bound; BN defaults).
    fan_in = C_IN * K
    bound = 1.0 / math.sqrt(fan_in)
    weight = jax.random.uniform(kw, (C_OUT, C_IN, K), jnp.float32, -bound, bound)
    gamma = jnp.ones((C_OUT,), jnp.float32)
    beta = jnp.zeros((C_OUT,), jnp.float32)

    out = cnn_layer(x, weight, gamma, beta)
    jax.block_until_ready(out)
    assert out.shape == (N, C_OUT, L), out.shape
    assert bool(jnp.all(jnp.isfinite(out))), "non-finite output"
    print("KERNEL_OK")
</pallas_src>

<mosaic_0001>
module attributes {stable_mosaic.version = 11 : i64} {
  func.func @conv_stats_kernel(%arg0: i32, %arg1: memref<2x20x128xbf16, #tpu.memory_space<vmem>>, %arg2: memref<640x128xbf16, #tpu.memory_space<vmem>>, %arg3: memref<2x16x128xf32, #tpu.memory_space<vmem>>, %arg4: memref<1x2x128xf32, #tpu.memory_space<vmem>>) attributes {dimension_semantics = [#tpu.dimension_semantics<parallel>], iteration_bounds = array<i64: 1>, scalar_prefetch = 0 : i64, scratch_operands = 0 : i64, tpu.core_type = #tpu.core_type<tc>, window_params = [{transform_indices = @transform_0, window_bounds = array<i64: 2, 20, 128>}, {pipeline_mode = #tpu.pipeline_mode<synchronous>, transform_indices = @transform_1, window_bounds = array<i64: 640, 128>}, {transform_indices = @transform_2, window_bounds = array<i64: 2, 16, 128>}, {transform_indices = @transform_3, window_bounds = array<i64: 1, 2, 128>}]} {
    %c0 = arith.constant 0 : index
    %c0_0 = arith.constant 0 : index
    %c0_1 = arith.constant 0 : index
    %0 = vector.load %arg1[%c0, %c0_0, %c0_1] : memref<2x20x128xbf16, #tpu.memory_space<vmem>>, vector<2x16x128xbf16>
    %c0_2 = arith.constant 0 : index
    %c1 = arith.constant 1 : index
    %c0_3 = arith.constant 0 : index
    %1 = vector.load %arg1[%c0_2, %c1, %c0_3] : memref<2x20x128xbf16, #tpu.memory_space<vmem>>, vector<2x16x128xbf16>
    %c0_4 = arith.constant 0 : index
    %c2 = arith.constant 2 : index
    %c0_5 = arith.constant 0 : index
    %2 = vector.load %arg1[%c0_4, %c2, %c0_5] : memref<2x20x128xbf16, #tpu.memory_space<vmem>>, vector<2x16x128xbf16>
    %c0_6 = arith.constant 0 : index
    %c3 = arith.constant 3 : index
    %c0_7 = arith.constant 0 : index
    %3 = vector.load %arg1[%c0_6, %c3, %c0_7] : memref<2x20x128xbf16, #tpu.memory_space<vmem>>, vector<2x16x128xbf16>
    %c0_8 = arith.constant 0 : index
    %c4 = arith.constant 4 : index
    %c0_9 = arith.constant 0 : index
    %4 = vector.load %arg1[%c0_8, %c4, %c0_9] : memref<2x20x128xbf16, #tpu.memory_space<vmem>>, vector<2x16x128xbf16>
    %5 = tpu.concatenate %0, %1, %2, %3, %4 in 2 : vector<2x16x128xbf16>, vector<2x16x128xbf16>, vector<2x16x128xbf16>, vector<2x16x128xbf16>, vector<2x16x128xbf16> -> vector<2x16x640xbf16>
    %6 = vector.shape_cast %5 : vector<2x16x640xbf16> to vector<32x640xbf16>
    %c0_10 = arith.constant 0 : index
    %c0_11 = arith.constant 0 : index
    %7 = vector.load %arg2[%c0_10, %c0_11] : memref<640x128xbf16, #tpu.memory_space<vmem>>, vector<640x128xbf16>
    %cst = arith.constant dense<0.000000e+00> : vector<32x128xf32>
    %8 = tpu.matmul %6, %7, %cst {dimension_numbers = #tpu.dot_dimension_numbers<[1], [0], [0], [1], [0, 0, 1, 1], [], []>} : vector<32x640xbf16>, vector<640x128xbf16>, vector<32x128xf32> -> vector<32x128xf32>
    %9 = vector.shape_cast %8 : vector<32x128xf32> to vector<2x16x128xf32>
    %c0_12 = arith.constant 0 : index
    %c0_13 = arith.constant 0 : index
    %c0_14 = arith.constant 0 : index
    %10 = vector.load %arg3[%c0_12, %c0_13, %c0_14] : memref<2x16x128xf32, #tpu.memory_space<vmem>>, vector<2x16x128xf32>
    tpu.vector_store %arg3[%c0_12, %c0_13, %c0_14], %9 {strides = array<i32>} : memref<2x16x128xf32, #tpu.memory_space<vmem>>, vector<2x16x128xf32>,
    %cst_15 = arith.constant dense<0.000000e+00> : vector<128xf32>
    %11 = vector.multi_reduction <add>, %8, %cst_15 [0] : vector<32x128xf32> to vector<128xf32>
    %12 = vector.shape_cast %11 : vector<128xf32> to vector<1x128xf32>
    %13 = arith.mulf %8, %8 : vector<32x128xf32>
    %cst_16 = arith.constant dense<0.000000e+00> : vector<128xf32>
    %14 = vector.multi_reduction <add>, %13, %cst_16 [0] : vector<32x128xf32> to vector<128xf32>
    %15 = vector.shape_cast %14 : vector<128xf32> to vector<1x128xf32>
    %16 = tpu.concatenate %12, %15 in 0 : vector<1x128xf32>, vector<1x128xf32> -> vector<2x128xf32>
    %17 = vector.shape_cast %16 : vector<2x128xf32> to vector<1x2x128xf32>
    %c0_17 = arith.constant 0 : index
    %c0_18 = arith.constant 0 : index
    %c0_19 = arith.constant 0 : index
    %18 = vector.load %arg4[%c0_17, %c0_18, %c0_19] : memref<1x2x128xf32, #tpu.memory_space<vmem>>, vector<1x2x128xf32>
    tpu.vector_store %arg4[%c0_17, %c0_18, %c0_19], %17 {strides = array<i32>} : memref<1x2x128xf32, #tpu.memory_space<vmem>>, vector<1x2x128xf32>,
    return
  }
  func.func @transform_0(%arg0: i32) -> (i32, i32, i32) {
    %c0_i32 = arith.constant 0 : i32
    %c0_i32_0 = arith.constant 0 : i32
    %c0_i32_1 = arith.constant 0 : i32
    return %arg0, %c0_i32, %c0_i32_0 : i32, i32, i32
  }
  func.func @transform_1(%arg0: i32) -> (i32, i32) {
    %c0_i32 = arith.constant 0 : i32
    %c0_i32_0 = arith.constant 0 : i32
    %c0_i32_1 = arith.constant 0 : i32
    return %c0_i32, %c0_i32_0 : i32, i32
  }
  func.func @transform_2(%arg0: i32) -> (i32, i32, i32) {
    %c0_i32 = arith.constant 0 : i32
    %c0_i32_0 = arith.constant 0 : i32
    %c0_i32_1 = arith.constant 0 : i32
    return %arg0, %c0_i32, %c0_i32_0 : i32, i32, i32
  }
  func.func @transform_3(%arg0: i32) -> (i32, i32, i32) {
    %c0_i32 = arith.constant 0 : i32
    %c0_i32_0 = arith.constant 0 : i32
    %c0_i32_1 = arith.constant 0 : i32
    return %arg0, %c0_i32, %c0_i32_0 : i32, i32, i32
  }
}

module attributes {stable_mosaic.version = 11 : i64} {
  func.func @bn_gelu_kernel(%arg0: i32, %arg1: memref<32x128xf32, #tpu.memory_space<vmem>>, %arg2: memref<1x128xf32, #tpu.memory_space<vmem>>, %arg3: memref<1x128xf32, #tpu.memory_space<vmem>>, %arg4: memref<32x128xf32, #tpu.memory_space<vmem>>) attributes {dimension_semantics = [#tpu.dimension_semantics<parallel>], iteration_bounds = array<i64: 1>, scalar_prefetch = 0 : i64, scratch_operands = 0 : i64, tpu.core_type = #tpu.core_type<tc>, window_params = [{transform_indices = @transform_0, window_bounds = array<i64: 32, 128>}, {pipeline_mode = #tpu.pipeline_mode<synchronous>, transform_indices = @transform_1, window_bounds = array<i64: 1, 128>}, {pipeline_mode = #tpu.pipeline_mode<synchronous>, transform_indices = @transform_2, window_bounds = array<i64: 1, 128>}, {transform_indices = @transform_3, window_bounds = array<i64: 32, 128>}]} {
    %c0 = arith.constant 0 : index
    %c0_0 = arith.constant 0 : index
    %0 = vector.load %arg1[%c0, %c0_0] : memref<32x128xf32, #tpu.memory_space<vmem>>, vector<32x128xf32>
    %c0_1 = arith.constant 0 : index
    %c0_2 = arith.constant 0 : index
    %1 = vector.load %arg2[%c0_1, %c0_2] : memref<1x128xf32, #tpu.memory_space<vmem>>, vector<1x128xf32>
    %2 = vector.broadcast %1 : vector<1x128xf32> to vector<32x128xf32>
    %3 = arith.mulf %0, %2 : vector<32x128xf32>
    %c0_3 = arith.constant 0 : index
    %c0_4 = arith.constant 0 : index
    %4 = vector.load %arg3[%c0_3, %c0_4] : memref<1x128xf32, #tpu.memory_space<vmem>>, vector<1x128xf32>
    %5 = vector.broadcast %4 : vector<1x128xf32> to vector<32x128xf32>
    %6 = arith.addf %3, %5 : vector<32x128xf32>
    %cst = arith.constant 5.000000e-01 : f32
    %7 = vector.broadcast %cst : f32 to vector<32x128xf32>
    %8 = arith.mulf %7, %6 : vector<32x128xf32>
    %cst_5 = arith.constant 0.707106769 : f32
    %9 = vector.broadcast %cst_5 : f32 to vector<32x128xf32>
    %10 = arith.mulf %6, %9 : vector<32x128xf32>
    %11 = math.erf %10 : vector<32x128xf32>
    %cst_6 = arith.constant 1.000000e+00 : f32
    %12 = vector.broadcast %cst_6 : f32 to vector<32x128xf32>
    %13 = arith.addf %12, %11 : vector<32x128xf32>
    %14 = arith.mulf %8, %13 : vector<32x128xf32>
    %c0_7 = arith.constant 0 : index
    %c0_8 = arith.constant 0 : index
    %15 = vector.load %arg4[%c0_7, %c0_8] : memref<32x128xf32, #tpu.memory_space<vmem>>, vector<32x128xf32>
    tpu.vector_store %arg4[%c0_7, %c0_8], %14 {strides = array<i32>} : memref<32x128xf32, #tpu.memory_space<vmem>>, vector<32x128xf32>,
    return
  }
  func.func @transform_0(%arg0: i32) -> (i32, i32) {
    %c0_i32 = arith.constant 0 : i32
    %c0_i32_0 = arith.constant 0 : i32
    return %arg0, %c0_i32 : i32, i32
  }
  func.func @transform_1(%arg0: i32) -> (i32, i32) {
    %c0_i32 = arith.constant 0 : i32
    %c0_i32_0 = arith.constant 0 : i32
    %c0_i32_1 = arith.constant 0 : i32
    return %c0_i32, %c0_i32_0 : i32, i32
  }
  func.func @transform_2(%arg0: i32) -> (i32, i32) {
    %c0_i32 = arith.constant 0 : i32
    %c0_i32_0 = arith.constant 0 : i32
    %c0_i32_1 = arith.constant 0 : i32
    return %c0_i32, %c0_i32_0 : i32, i32
  }
  func.func @transform_3(%arg0: i32) -> (i32, i32) {
    %c0_i32 = arith.constant 0 : i32
    %c0_i32_0 = arith.constant 0 : i32
    return %arg0, %c0_i32 : i32, i32
  }
}

</mosaic_0001>

<bundles_post_ra>
// kernel: _cnn_layer_impl.3
= control target key start
LH: loop header
LB: loop body
LE: loop exit
PB: predicated region body
PF: predicated region fallthrough
CT: control target
= control target key end

     0   :  { %s128_s0 = inlined_call_operand.vmem [shape: f32[32,128], index: 0, kind: input, shape index: {}, may-alias: {0,3}]   ;;  %s129_s1 = inlined_call_operand.vmem [shape: f32[1,128], index: 1, kind: input, shape index: {}]   ;;  %s130_s2 = inlined_call_operand.vmem [shape: f32[1,128], index: 2, kind: input, shape index: {}]   ;;  %s131_s3 = inlined_call_operand.vmem [shape: f32[32,128], index: 3, kind: output, shape index: {}, may-alias: {0,3}]  }
   0x1   :  { %v14_v0 = vld [vmem:[%s128_s0] sm:$0xff]  ;;  %v15_v4 = vld [vmem:[%s128_s0 + $0x8] sm:$0xff]  ;;  %v16_v5 = vld [vmem:[%s128_s0 + $0x10] sm:$0xff] }
   0x2   :  { %v68_v1 = vld [vmem:[%s129_s1] ss:$0 sm:$0xff]  ;;  %v17_v6 = vld [vmem:[%s128_s0 + $0x18] sm:$0xff] }
   0x3   :  { %v69_v2 = vld [vmem:[%s130_s2] ss:$0 sm:$0xff]  ;;  %v25_v3 = vmul.f32 %v68_v1, %v14_v0  ;;  %v26_v7 = vmul.f32 %v68_v1, %v15_v4  ;;  %v27_v8 = vmul.f32 %v68_v1, %v16_v5  ;;  %v28_v9 = vmul.f32 %v68_v1, %v17_v6 }
   0x5   :  { %v36_v10 = vadd.f32 %v69_v2, %v25_v3  ;;  %v37_v11 = vadd.f32 %v69_v2, %v26_v7  ;;  %v38_v12 = vadd.f32 %v69_v2, %v27_v8  ;;  %v39_v13 = vadd.f32 %v69_v2, %v28_v9 }
   0x7   :  { %v44_v14 = vmul.f32 0.70710677, %v36_v10  ;;  %v45_v15 = vmul.f32 0.70710677, %v37_v11  ;;  %v46_v16 = vmul.f32 0.70710677, %v38_v12 }
   0x8   :  { %v47_v17 = vmul.f32 0.70710677, %v39_v13  ;;  %v40_v18 = vmul.f32 0.5, %v36_v10  ;;  %v41_v20 = vmul.f32 0.5, %v37_v11  ;;  %v42_v23 = vmul.f32 0.5, %v38_v12 }
   0x9   :  { %70 = verf.f32 %v44_v14  ;;  %v43_v26 = vmul.f32 0.5, %v39_v13 }
   0xa   :  { %72 = verf.f32 %v45_v15 }
   0xb   :  { %74 = verf.f32 %v46_v16 }
   0xc   :  { %76 = verf.f32 %v47_v17 }
  0x16   :  { %v71_v19 = vpop.eup %70 }
  0x17   :  { %v73_v21 = vpop.eup %72  ;;  %v52_v22 = vadd.f32 1.0, %v71_v19 }
  0x18   :  { %v75_v24 = vpop.eup %74  ;;  %v53_v25 = vadd.f32 1.0, %v73_v21 }
  0x19   :  { %v77_v27 = vpop.eup %76  ;;  %v56_v28 = vmul.f32 %v52_v22, %v40_v18  ;;  %v54_v29 = vadd.f32 1.0, %v75_v24 }
  0x1a   :  { %v57_v30 = vmul.f32 %v53_v25, %v41_v20  ;;  %v55_v31 = vadd.f32 1.0, %v77_v27 }
  0x1b   :  { %60 = vst [vmem:[%s131_s3] sm:$0xff] %v56_v28  ;;  %v58_v32 = vmul.f32 %v54_v29, %v42_v23 }
  0x1c   :  { %61 = vst [vmem:[%s131_s3 + $0x8] sm:$0xff] %v57_v30  ;;  %v59_v33 = vmul.f32 %v55_v31, %v43_v26 }
  0x1d   :  { %62 = vst [vmem:[%s131_s3 + $0x10] sm:$0xff] %v58_v32 }
  0x1e   :  { %63 = vst [vmem:[%s131_s3 + $0x18] sm:$0xff] %v59_v33 }

// kernel: _cnn_layer_impl.2
= control target key start
LH: loop header
LB: loop body
LE: loop exit
PB: predicated region body
PF: predicated region fallthrough
CT: control target
= control target key end

     0   :  { %vm44_vm0 = vsmask.f32 7424  ;;  %vm92_vm1 = vsmask.f32 6400  ;;  %vm77_vm2 = vcmask 1046528   ;;  %vm135_vm3 = vcmask 1045504   ;;  %s1043_s1 = inlined_call_operand.vmem [shape: bf16[640,128], index: 1, kind: input, shape index: {}]   ;;  %s1044_s0 = inlined_call_operand.vmem [shape: bf16[2,20,128], index: 0, kind: input, shape index: {}]   ;;  %s1045_s2 = inlined_call_operand.vmem [shape: f32[2,16,128], index: 2, kind: output, shape index: {0}]   ;;  %s1046_s3 = inlined_call_operand.vmem [shape: f32[1,2,128], index: 3, kind: output, shape index: {1}]  }
   0x1   :  { %v784_v0 = vld [vmem:[%s1043_s1 + $0x78] sm:$0xff]   ;;  %v788_v4 = vld [vmem:[%s1043_s1 + $0x70] sm:$0xff]   ;;  %v792_v8 = vld [vmem:[%s1043_s1 + $0x68] sm:$0xff]   ;;  %vm637_vm4 = vcmask 1040384  }
   0x2   :  { %v785_v1 = vld [vmem:[%s1043_s1 + $0xf8] sm:$0xff]   ;;  %698 = vmatprep.subr.bf16.mxu0 %v784_v0  ;;  %v789_v5 = vld [vmem:[%s1043_s1 + $0xf0] sm:$0xff]   ;;  %v793_v9 = vld [vmem:[%s1043_s1 + $0xe8] sm:$0xff]  }
   0x3   :  { %v786_v2 = vld [vmem:[%s1043_s1 + $0x38] sm:$0xff]   ;;  %726 = vmatprep.subr.bf16.mxu1 %v785_v1  ;;  %v790_v6 = vld [vmem:[%s1043_s1 + $0x30] sm:$0xff]   ;;  %v794_v10 = vld [vmem:[%s1043_s1 + $0x28] sm:$0xff]  }
   0x4   :  { %v787_v3 = vld [vmem:[%s1043_s1 + $0xb8] sm:$0xff]   ;;  %699 = vmatpush3.bf16.msra.mxu0 %v786_v2  ;;  %v791_v7 = vld [vmem:[%s1043_s1 + $0xb0] sm:$0xff]   ;;  %v795_v11 = vld [vmem:[%s1043_s1 + $0xa8] sm:$0xff]  }
   0x5   :  { %727 = vmatpush3.bf16.msra.mxu1 %v787_v3  ;;  %700 = vmatprep.subr.bf16.mxu0 %v788_v4  ;;  %v796_v12 = vld [vmem:[%s1043_s1 + $0x60] sm:$0xff]   ;;  %v800_v16 = vld [vmem:[%s1043_s1 + $0x58] sm:$0xff]   ;;  %v804_v20 = vld [vmem:[%s1043_s1 + $0x50] sm:$0xff]  }
   0x6   :  { %728 = vmatprep.subr.bf16.mxu1 %v789_v5  ;;  %v797_v13 = vld [vmem:[%s1043_s1 + $0xe0] sm:$0xff]   ;;  %v801_v17 = vld [vmem:[%s1043_s1 + $0xd8] sm:$0xff]   ;;  %v805_v21 = vld [vmem:[%s1043_s1 + $0xd0] sm:$0xff]  }
   0x7   :  { %v798_v14 = vld [vmem:[%s1043_s1 + $0x20] sm:$0xff]   ;;  %v802_v18 = vld [vmem:[%s1043_s1 + $0x18] sm:$0xff]   ;;  %v806_v22 = vld [vmem:[%s1043_s1 + $0x10] sm:$0xff]  }
   0x8   :  { %701 = vmatpush3.bf16.msra.mxu0 %v790_v6  ;;  %v799_v15 = vld [vmem:[%s1043_s1 + $0xa0] sm:$0xff]   ;;  %v803_v19 = vld [vmem:[%s1043_s1 + $0x98] sm:$0xff]   ;;  %v807_v23 = vld [vmem:[%s1043_s1 + $0x90] sm:$0xff]  }
   0x9   :  { %729 = vmatpush3.bf16.msra.mxu1 %v791_v7  ;;  %702 = vmatprep.subr.bf16.mxu0 %v792_v8  ;;  %v808_v24 = vld [vmem:[%s1043_s1 + $0x48] sm:$0xff]   ;;  %v812_v28 = vld [vmem:[%s1043_s1 + $0x40] sm:$0xff]   ;;  %v820_v37 = vld [vmem:[%s1043_s1 + $0x138] sm:$0xff]  }
   0xa   :  { %730 = vmatprep.subr.bf16.mxu1 %v793_v9  ;;  %v809_v25 = vld [vmem:[%s1043_s1 + $0xc8] sm:$0xff]   ;;  %v813_v29 = vld [vmem:[%s1043_s1 + $0xc0] sm:$0xff]   ;;  %v821_v60 = vld [vmem:[%s1043_s1 + $0x130] sm:$0xff]  }
   0xb   :  { %v810_v26 = vld [vmem:[%s1043_s1 + $0x8] sm:$0xff]   ;;  %v814_v30 = vld [vmem:[%s1043_s1] sm:$0xff]   ;;  %v17_v63 = vld [vmem:[%s1044_s0 + $0x10] sm:$0xf] }
   0xc   :  { %703 = vmatpush3.bf16.msra.mxu0 %v794_v10  ;;  %v811_v27 = vld [vmem:[%s1043_s1 + $0x88] sm:$0xff]   ;;  %v815_v31 = vld [vmem:[%s1043_s1 + $0x80] sm:$0xff]   ;;  %v826_v2 = vld [vmem:[%s1044_s0 + $0x14] ss:$0 sps:$4 sm:$0x11]  }
   0xd   :  { %731 = vmatpush3.bf16.msra.mxu1 %v795_v11  ;;  %704 = vmatprep.subr.bf16.mxu0 %v796_v12  ;;  %v14_v32 = vld [vmem:[%s1044_s0] sm:$0xf]  ;;  %v956_v33 = vld [vmem:[%s1044_s0 + $0x4] sm:$0xf]  ;;  %v16_v61 = vld [vmem:[%s1044_s0 + $0xc] sm:$0xf] }
   0xe   :  { %732 = vmatprep.subr.bf16.mxu1 %v797_v13  ;;  %v648_v34 = vcombine.low %v14_v32, %v956_v33  ;;  %v817_v35 = vld [vmem:[%s1044_s0 + $0x8] ss:$0 sps:$4 sm:$0x11]   ;;  %v20_v36 = vld [vmem:[%s1044_s0] sm:$0xe]  ;;  %v649_v1 = vcombine.low %v16_v61, %v17_v63  ;;  %v65_v8 = vshll.u32 %v826_v2, 16 }
   0xf   :  { %v652_v38 = vcombine.low %v20_v36, %v956_v33  ;;  %v972_v39 = vld [vmem:[%s1044_s0 + $0x8] ss:$0 sps:$4 sm:$0x33]   ;;  %v53_v42 = vshll.u32 %v817_v35, 16  ;;  %v79_v50 = vrot.slane %v817_v35, 1  ;;  %v824_v32 = vld [vmem:[%s1043_s1 + $0x118] sm:$0xff]  }
  0x10   :  { %705 = vmatpush3.bf16.msra.mxu0 %v798_v14  ;;  %v46_v40 = vshrl.u32 %v648_v34, 16  ;;  %v48_v41 = vshll.u32 %v648_v34, 16  ;;  %v102_v45 = vshrl.u32 %v972_v39, 16  ;;  %v105_v46 = vshll.u32 %v972_v39, 16  ;;  %v21_v0 = vld [vmem:[%s1044_s0 + $0xc] sm:$0xe] }
  0x11   :  { %733 = vmatpush3.bf16.msra.mxu1 %v799_v15  ;;  %706 = vmatprep.subr.bf16.mxu0 %v800_v16  ;;  %v94_v43 = vshrl.u32 %v652_v38, 16  ;;  %v97_v44 = vshll.u32 %v652_v38, 16  ;;  %v55_v48 = vrot.slane %v53_v42, 1  ;;  %v78_v49 = vrot.slane %v652_v38, 1  ;;  %v822_v4 = vld [vmem:[%s1043_s1 + $0x128] sm:$0xff]   ;;  %v831_v38 = vld [vmem:[%s1043_s1 + $0x100] sm:$0xff]  }
  0x12   :  { %734 = vmatprep.subr.bf16.mxu1 %v801_v17  ;;  %v50_v47 = vrot.slane %v48_v41, 1  ;;  %v104_v53 = vrot.slane %v102_v45, 1  ;;  %v107_v54 = vrot.slane %v105_v46, 2  ;;  %v653_v3 = vcombine.low %v21_v0, %v17_v63  ;;  %v828_v5 = vld [vmem:[%s1044_s0 + $0x14] ss:$0 sps:$4 sm:$0x33]  }
  0x13   :  { %v96_v51 = vrot.slane %v94_v43, 1  ;;  %v99_v52 = vrot.slane %v97_v44, 2  ;;  %v80_v59 = vsel %vm77_vm2, %v78_v49, %v79_v50  ;;  %v58_v6 = vshrl.u32 %v649_v1, 16  ;;  %v830_v35 = vld [vmem:[%s1043_s1 + $0x108] sm:$0xff]  }
  0x14   :  { %707 = vmatpush3.bf16.msra.mxu0 %v802_v18  ;;  %v51_v55 = vor.u32 %v50_v47, %v46_v40  ;;  %v108_v57 = vor.u32 %v107_v54, %v104_v53  ;;  %v60_v7 = vshll.u32 %v649_v1, 16  ;;  %v111_v9 = vshrl.u32 %v653_v3, 16  ;;  %v25_v36 = vld [vmem:[%s1044_s0 + $0xc] sm:$0xc] }
  0x15   :  { %735 = vmatpush3.bf16.msra.mxu1 %v803_v19  ;;  %708 = vmatprep.subr.bf16.mxu0 %v804_v20  ;;  %v100_v56 = vor.u32 %v99_v52, %v96_v51  ;;  %v114_v10 = vshll.u32 %v653_v3, 16  ;;  %v119_v11 = vshrl.u32 %v828_v5, 16  ;;  %v122_v12 = vshll.u32 %v828_v5, 16 }
  0x16   :  { %736 = vmatprep.subr.bf16.mxu1 %v805_v21  ;;  %v56_v58 = vsel %vm44_vm0, %v51_v55, %v55_v48  ;;  %v81_v13 = vrot.slane %v653_v3, 1  ;;  %v62_v14 = vrot.slane %v60_v7, 1  ;;  %v67_v15 = vrot.slane %v65_v8, 1  ;;  %v823_v21 = vld [vmem:[%s1043_s1 + $0x120] sm:$0xff]  }
  0x17   :  { %496 = vmatprep.mubr.bf16.mxu0 %v56_v58  ;;  %v109_v62 = vsel %vm92_vm1, %v100_v56, %v108_v57  ;;  %v113_v16 = vrot.slane %v111_v9, 1  ;;  %v82_v17 = vrot.slane %v826_v2, 1  ;;  %v116_v18 = vrot.slane %v114_v10, 2 }
  0x18   :  { %709 = vmatpush3.bf16.msra.mxu0 %v806_v22  ;;  %545 = vmatprep.mubr.bf16.mxu1 %v109_v62  ;;  %v121_v19 = vrot.slane %v119_v11, 1  ;;  %v124_v20 = vrot.slane %v122_v12, 2  ;;  %v63_v22 = vor.u32 %v62_v14, %v58_v6  ;;  %v140_v40 = vrot.slane %v828_v5, 2 }
  0x19   :  { %737 = vmatpush3.bf16.msra.mxu1 %v807_v23  ;;  %710 = vmatprep.subr.bf16.mxu0 %v808_v24  ;;  %v24_v23 = vld [vmem:[%s1044_s0] sm:$0xc]  ;;  %v117_v24 = vor.u32 %v116_v18, %v113_v16 }
  0x1a   :  { %738 = vmatprep.subr.bf16.mxu1 %v809_v25  ;;  %v125_v25 = vor.u32 %v124_v20, %v121_v19 }
  0x1c   :  { %711 = vmatpush3.bf16.msra.mxu0 %v810_v26  ;;  %v656_v26 = vcombine.low %v24_v23, %v956_v33 }
  0x1d   :  { %739 = vmatpush3.bf16.msra.mxu1 %v811_v27  ;;  %712 = vmatprep.subr.bf16.mxu0 %v812_v28  ;;  %v137_v27 = vrot.slane %v972_v39, 2  ;;  %v68_v28 = vsel %vm44_vm0, %v63_v22, %v67_v15 }
  0x1e   :  { %740 = vmatprep.subr.bf16.mxu1 %v813_v29  ;;  %v83_v29 = vsel %vm77_vm2, %v81_v13, %v82_v17 }
  0x20   :  { %713 = vmatpush3.bf16.msra.mxu0 %v814_v30  ;;  %v126_v30 = vsel %vm92_vm1, %v117_v24, %v125_v25 }
  0x21   :  { %741 = vmatpush3.bf16.msra.mxu1 %v815_v31  ;;  %764 = vmatprep.subr.bf16.mxu0 %v820_v37  ;;  %v136_v31 = vrot.slane %v656_v26, 2 }
  0x23   :  { %497 = vmatmul.mubr.bf16.vlgmr.msra.gmra.mxu0 %v648_v34  ;;  %v138_v33 = vsel %vm135_vm3, %v136_v31, %v137_v27  ;;  %v829_v34 = vld [vmem:[%s1043_s1 + $0x110] sm:$0xff]  }
  0x24   :  { %546 = vmatmul.mubr.bf16.vlgmr.msra.gmra.mxu1 %v80_v59  ;;  %765 = vmatpush3.bf16.msra.mxu0 %v820_v37  ;;  %v657_v37 = vcombine.low %v25_v36, %v17_v63 }
  0x25   :  { %766 = vmatprep.subr.bf16.mxu0 %v821_v60  ;;  %504 = vmatprep.mubr.bf16.mxu0 %v68_v28 }
  0x26   :  { %553 = vmatprep.mubr.bf16.mxu1 %v126_v30  ;;  %v139_v39 = vrot.slane %v657_v37, 2 }
  0x28   :  { %767 = vmatpush3.bf16.msra.mxu0 %v821_v60  ;;  %v141_v41 = vsel %vm135_vm3, %v139_v39, %v140_v40 }
  0x29   :  { %768 = vmatprep.subr.bf16.mxu0 %v822_v4 }
  0x2b   :  { %505 = vmatmul.mubr.bf16.gmra.mxu0 %v649_v1 }
  0x2c   :  { %769 = vmatpush3.bf16.msra.mxu0 %v822_v4  ;;  %554 = vmatmul.mubr.bf16.gmra.mxu1 %v83_v29 }
  0x2d   :  { %770 = vmatprep.subr.bf16.mxu0 %v823_v21  ;;  %780 = vmatprep.mubr.bf16.mxu0 %v138_v33 }
  0x30   :  { %771 = vmatpush3.bf16.msra.mxu0 %v823_v21 }
  0x31   :  { %772 = vmatprep.subr.bf16.mxu0 %v824_v32 }
  0x34   :  { %773 = vmatpush3.bf16.msra.mxu0 %v824_v32 }
  0x35   :  { %774 = vmatprep.subr.bf16.mxu0 %v829_v34 }
  0x38   :  { %775 = vmatpush3.bf16.msra.mxu0 %v829_v34 }
  0x39   :  { %776 = vmatprep.subr.bf16.mxu0 %v830_v35 }
  0x3c   :  { %777 = vmatpush3.bf16.msra.mxu0 %v830_v35 }
  0x3d   :  { %778 = vmatprep.subr.bf16.mxu0 %v831_v38 }
  0x40   :  { %779 = vmatpush3.bf16.msra.mxu0 %v831_v38 }
  0x43   :  { %781 = vmatmul.mubr.bf16.vlgmr.msra.gmra.mxu0 %v141_v41 }
  0xe3   :  { %v714_v42 = vpop.f32.mrf.mxu0 }
  0xe4   :  { %v742_v43 = vpop.f32.mrf.mxu1 }
  0xe5   :  { %v715_v44 = vpop.f32.mrf.mxu0 }
  0xe6   :  { %v743_v45 = vpop.f32.mrf.mxu1  ;;  %v716_v60 = vadd.f32 %v715_v44, %v714_v42 }
  0xe7   :  { %v717_v46 = vpop.f32.mrf.mxu0  ;;  %v744_v61 = vadd.f32 %v743_v45, %v742_v43 }
  0xe8   :  { %v745_v47 = vpop.f32.mrf.mxu1 }
  0xe9   :  { %v718_v48 = vpop.f32.mrf.mxu0  ;;  %v548_v5 = vadd.f32 %v744_v61, %v716_v60 }
  0xea   :  { %v746_v49 = vpop.f32.mrf.mxu1  ;;  %v719_v2 = vadd.f32 %v718_v48, %v717_v46 }
  0xeb   :  { %v720_v50 = vpop.f32.mrf.mxu0  ;;  %v747_v3 = vadd.f32 %v746_v49, %v745_v47 }
  0xec   :  { %v748_v51 = vpop.f32.mrf.mxu1 }
  0xed   :  { %v721_v52 = vpop.f32.mrf.mxu0  ;;  %v551_v11 = vadd.f32 %v747_v3, %v719_v2 }
  0xee   :  { %v749_v53 = vpop.f32.mrf.mxu1  ;;  %v722_v56 = vadd.f32 %v721_v52, %v720_v50 }
  0xef   :  { %v723_v54 = vpop.f32.mrf.mxu0  ;;  %v750_v57 = vadd.f32 %v749_v53, %v748_v51 }
  0xf0   :  { %v751_v55 = vpop.f32.mrf.mxu1 }
  0xf1   :  { %v724_v58 = vpop.f32.mrf.mxu0  ;;  %v556_v0 = vadd.f32 %v750_v57, %v722_v56 }
  0xf2   :  { %v752_v59 = vpop.f32.mrf.mxu1  ;;  %v725_v62 = vadd.f32 %v724_v58, %v723_v54 }
  0xf3   :  { %v753_v63 = vadd.f32 %v752_v59, %v751_v55 }
  0xf5   :  { %v559_v8 = vadd.f32 %v753_v63, %v725_v62 }
 0x103   :  { %v782_v1 = vpop.f32.mrf.mxu0 }
 0x104   :  { %v605_v4 = vadd.f32 %v782_v1, %v556_v0 }
 0x105   :  { %v596_v6 = vpop.f32.mrf.mxu0 }
 0x106   :  { %613 = vst [vmem:[%s1045_s2 + $0x10] sm:$0xff] %v605_v4  ;;  %v597_v7 = vadd.f32 %v596_v6, %v548_v5  ;;  %v626_v17 = vmul.f32 %v605_v4, %v605_v4 }
 0x107   :  { %v783_v9 = vpop.f32.mrf.mxu0 }
 0x108   :  { %611 = vst [vmem:[%s1045_s2] sm:$0xff] %v597_v7  ;;  %v608_v10 = vadd.f32 %v783_v9, %v559_v8  ;;  %v624_v14 = vmul.f32 %v597_v7, %v597_v7 }
 0x109   :  { %v599_v12 = vpop.f32.mrf.mxu0 }
 0x10a   :  { %614 = vst [vmem:[%s1045_s2 + $0x18] sm:$0xff] %v608_v10  ;;  %v600_v13 = vadd.f32 %v599_v12, %v551_v11  ;;  %v627_v20 = vmul.f32 %v608_v10, %v608_v10 }
 0x10c   :  { %612 = vst [vmem:[%s1045_s2 + $0x8] sm:$0xff] %v600_v13  ;;  %v615_v15 = vadd.f32 %v600_v13, %v597_v7  ;;  %v625_v16 = vmul.f32 %v600_v13, %v600_v13 }
 0x10e   :  { %v616_v18 = vadd.f32 %v615_v15, %v605_v4  ;;  %v628_v19 = vadd.f32 %v625_v16, %v624_v14 }
 0x110   :  { %v617_v21 = vadd.f32 %v616_v18, %v608_v10  ;;  %v629_v22 = vadd.f32 %v628_v19, %v626_v17 }
 0x112   :  { %v618_v23 = vrot.slane %v617_v21, 4  ;;  %v630_v24 = vadd.f32 %v629_v22, %v627_v20 }
 0x114   :  { %v619_v25 = vadd.f32 %v618_v23, %v617_v21  ;;  %v631_v26 = vrot.slane %v630_v24, 4 }
 0x116   :  { %v620_v27 = vrot.slane %v619_v25, 2  ;;  %v632_v28 = vadd.f32 %v631_v26, %v630_v24 }
 0x118   :  { %v621_v29 = vadd.f32 %v620_v27, %v619_v25  ;;  %v633_v30 = vrot.slane %v632_v28, 2 }
 0x11a   :  { %v622_v31 = vrot.slane %v621_v29, 1  ;;  %v634_v32 = vadd.f32 %v633_v30, %v632_v28 }
 0x11c   :  { %v635_v33 = vrot.slane %v634_v32, 1  ;;  %v623_v34 = vadd.f32 %v622_v31, %v621_v29 }
 0x11e   :  { %v636_v35 = vadd.f32 %v635_v33, %v634_v32 }
 0x120   :  { %v638_v36 = vsel %vm637_vm4, %v623_v34, %v636_v35 }
 0x121   :  { %639 = vst [vmem:[%s1046_s3] sm:$0x3] %v638_v36 }

</bundles_post_ra>
